<compile_context>
chip_gen: v7x
topology: tpu7x:2x2x1
jax: 0.10.0
libtpu: 0.0.40
codegen_flags: <defaults>
</compile_context>

<pallas_src>
import functools

import jax
import jax.numpy as jnp
from jax.experimental import pallas as pl
from jax.experimental.pallas import tpu as pltpu


# --------------------------------------------------------------------------- #
# Kernel bodies
# --------------------------------------------------------------------------- #
def _tile_squared_loss(feats, idxs, min_r, max_r):
    """Per-row squared sphere loss for one (T, D) tile. Returns (T, 1) f32."""
    f = feats.astype(jnp.float32)                              # widen in-kernel
    idx = idxs.astype(jnp.float32)                             # (T, 1)
    mag = jnp.sqrt(jnp.sum(f * f, axis=-1, keepdims=True))     # (T, 1) L2 norm
    ring = jnp.maximum(min_r - mag, 0.0)
    loss = jnp.where(idx >= 0.0, ring, mag)
    if max_r is not None:
        # Rows whose loss is exactly 0 (positives inside the ring, zero-mag
        # negatives) get the outer-sphere penalty added; 0 + clamp == clamp.
        loss = jnp.where(loss == 0.0, jnp.maximum(mag - max_r, 0.0), loss)
    return loss * loss


def _sphere_reduce_kernel(feats_ref, idxs_ref, out_ref, acc_ref, *,
                          min_r, max_r, n_rows, tile_rows, tiles_per_split):
    """'mean'/'sum' path: accumulate per-row losses into a vector scratch."""
    j = pl.program_id(1)

    @pl.when(j == 0)
    def _():
        acc_ref[...] = jnp.zeros_like(acc_ref)

    loss = _tile_squared_loss(feats_ref[...], idxs_ref[...], min_r, max_r)

    # Mask rows outside [0, n_rows): ragged tail of the last tile and any
    # clamped/duplicated tiles contribute exactly zero.
    tile_idx = pl.program_id(0) * tiles_per_split + j
    row = tile_idx * tile_rows + jax.lax.broadcasted_iota(
        jnp.int32, loss.shape, 0)
    loss = jnp.where(row < n_rows, loss, 0.0)

    acc_ref[...] += loss     # vector partial sums; no per-step scalar RMW

    @pl.when(j == tiles_per_split - 1)
    def _():
        total = jnp.sum(acc_ref[...], keepdims=True)           # (1, 1)
        # Lane-dense (8, 128) partial block per split (unmasked stores).
        out_ref[...] = jnp.broadcast_to(total, out_ref.shape)


def _sphere_rowwise_kernel(feats_ref, idxs_ref, out_ref, *, min_r, max_r):
    """'none' path: write per-row squared losses."""
    out_ref[...] = _tile_squared_loss(feats_ref[...], idxs_ref[...],
                                      min_r, max_r)


# --------------------------------------------------------------------------- #
# Wrapper
# --------------------------------------------------------------------------- #
def _pick_tile_rows(n_rows, feat_dim, itemsize):
    """Largest row tile (multiple of 8) fitting a v7x-safe VMEM budget."""
    budget = 40 * 1024 * 1024            # buffers + temps must stay < 48 MiB
    # double-buffered input tile + ~3 f32 full-tile temporaries per row
    per_row = feat_dim * (2 * itemsize + 3 * 4) + 64
    t = budget // per_row
    t = int(max(8, min(4096, (t // 8) * 8)))
    # Don't let the block exceed the row count (keeps boundary handling tame).
    t = min(t, max(8, (n_rows // 8) * 8))
    return t


@functools.partial(
    jax.jit,
    static_argnames=("min_action_sphere_radius", "max_action_sphere_radius",
                     "reduction", "tile_rows", "num_core_splits"))
def action_background_sphere_loss(actionbackground_features_allframes,
                                  actionbackground_idxs_allframes,
                                  *,
                                  min_action_sphere_radius,
                                  max_action_sphere_radius=None,
                                  reduction="mean",
                                  tile_rows=None,
                                  num_core_splits=2):
    """features: [N, D] float32/bfloat16; idxs: [N] (float or int)."""
    feats = actionbackground_features_allframes
    n_rows, feat_dim = feats.shape
    min_r = float(min_action_sphere_radius)
    max_r = (None if max_action_sphere_radius is None
             else float(max_action_sphere_radius))

    # Tiny per-row labels column (N*4 bytes; negligible vs. the feature read).
    idx_col = actionbackground_idxs_allframes.reshape(n_rows, 1).astype(
        jnp.float32)

    t = tile_rows if tile_rows is not None else _pick_tile_rows(
        n_rows, feat_dim, jnp.dtype(feats.dtype).itemsize)
    total_tiles = (n_rows + t - 1) // t
    last_tile = total_tiles - 1

    vmem_limit = 48 * 1024 * 1024        # > default scoped limit, < v7x 64 MiB

    if reduction == "none":
        out = pl.pallas_call(
            functools.partial(_sphere_rowwise_kernel, min_r=min_r, max_r=max_r),
            out_shape=jax.ShapeDtypeStruct((n_rows, 1), jnp.float32),
            grid_spec=pltpu.PrefetchScalarGridSpec(
                num_scalar_prefetch=0,
                grid=(total_tiles,),
                in_specs=[
                    pl.BlockSpec((t, feat_dim), lambda i: (i, 0)),
                    pl.BlockSpec((t, 1), lambda i: (i, 0)),
                ],
                out_specs=pl.BlockSpec((t, 1), lambda i: (i, 0)),
            ),
            compiler_params=pltpu.CompilerParams(
                dimension_semantics=("parallel",),
                vmem_limit_bytes=vmem_limit),
        )(feats, idx_col)
        return out[:, 0]

    # 'mean' / 'sum': split the row range over a leading "parallel" grid axis
    # (uses both TensorCores on v7x; harmless sequential outer loop elsewhere).
    n_split = max(1, min(int(num_core_splits), total_tiles))
    tiles_per_split = (total_tiles + n_split - 1) // n_split

    def row_block_map(i, j):
        # Clamp so every block start stays in-bounds; duplicated tiles are
        # masked to zero inside the kernel via the row-index check.
        return (jnp.minimum(i * tiles_per_split + j, last_tile), 0)

    partials = pl.pallas_call(
        functools.partial(_sphere_reduce_kernel, min_r=min_r, max_r=max_r,
                          n_rows=n_rows, tile_rows=t,
                          tiles_per_split=tiles_per_split),
        out_shape=jax.ShapeDtypeStruct((n_split * 8, 128), jnp.float32),
        grid_spec=pltpu.PrefetchScalarGridSpec(
            num_scalar_prefetch=0,
            grid=(n_split, tiles_per_split),
            in_specs=[
                pl.BlockSpec((t, feat_dim), row_block_map),
                pl.BlockSpec((t, 1), row_block_map),
            ],
            out_specs=pl.BlockSpec((8, 128), lambda i, j: (i, 0)),
            scratch_shapes=[pltpu.VMEM((t, 1), jnp.float32)],
        ),
        compiler_params=pltpu.CompilerParams(
            dimension_semantics=("parallel", "arbitrary"),
            vmem_limit_bytes=vmem_limit),
    )(feats, idx_col)

    # Each split's (8,128) slab is a broadcast of its scalar partial sum.
    total = jnp.sum(partials[::8, 0])
    if reduction == "sum":
        return total
    # 'mean' (torch.mean over all N per-frame losses)
    return total / jnp.float32(n_rows)


# --------------------------------------------------------------------------- #
# Pure-JAX reference (mirrors the PyTorch module)
# --------------------------------------------------------------------------- #
def _reference_loss(features, idxs, min_r, max_r, reduction):
    mag = jnp.sqrt(jnp.sum(features.astype(jnp.float32) ** 2, axis=1))
    ring = jnp.maximum(min_r - mag, 0.0)
    loss = jnp.where(idxs >= 0.0, ring, mag)
    if max_r is not None:
        loss = jnp.where(loss == 0.0, jnp.maximum(mag - max_r, 0.0), loss)
    loss = loss ** 2
    if reduction == "mean":
        return jnp.mean(loss)
    if reduction == "sum":
        return jnp.sum(loss)
    return loss


if __name__ == "__main__":
    key = jax.random.PRNGKey(0)
    k_feat, k_scale, k_idx = jax.random.split(key, 3)

    N, D = 24, 32
    min_r, max_r = 1.0, 2.0

    feats = jax.random.normal(k_feat, (N, D), dtype=jnp.float32)
    scale = jax.random.uniform(k_scale, (N, 1), minval=0.05, maxval=0.6)
    feats = feats * scale            # magnitudes spread below/inside/above ring
    idxs = jax.random.randint(k_idx, (N,), -2, 5).astype(jnp.float32)

    # 1) mean reduction; tiny tile override exercises multi-tile grid,
    #    the 2-way core split, and clamped duplicate tiles.
    out_mean = action_background_sphere_loss(
        feats, idxs, min_action_sphere_radius=min_r,
        max_action_sphere_radius=max_r, reduction="mean", tile_rows=8)
    out_mean = jax.block_until_ready(out_mean)
    ref_mean = _reference_loss(feats, idxs, min_r, max_r, "mean")
    assert jnp.allclose(out_mean, ref_mean, rtol=1e-5, atol=1e-5), (out_mean,
                                                                    ref_mean)

    # 2) sum reduction, no outer sphere, ragged row count (partial tail block
    #    + in-kernel row masking, no wrapper padding).
    N2 = 19
    out_sum = action_background_sphere_loss(
        feats[:N2], idxs[:N2], min_action_sphere_radius=min_r,
        max_action_sphere_radius=None, reduction="sum", tile_rows=8)
    out_sum = jax.block_until_ready(out_sum)
    ref_sum = _reference_loss(feats[:N2], idxs[:N2], min_r, None, "sum")
    assert jnp.allclose(out_sum, ref_sum, rtol=1e-5, atol=1e-5), (out_sum,
                                                                  ref_sum)

    # 3) 'none' reduction: per-frame losses, auto tile size.
    out_none = action_background_sphere_loss(
        feats, idxs, min_action_sphere_radius=min_r,
        max_action_sphere_radius=max_r, reduction="none")
    out_none = jax.block_until_ready(out_none)
    ref_none = _reference_loss(feats, idxs, min_r, max_r, "none")
    assert jnp.allclose(out_none, ref_none, rtol=1e-5, atol=1e-5), (out_none,
                                                                    ref_none)

    # 4) bf16 features, mean reduction, auto tile (exercises in-kernel widen).
    out_bf16 = action_background_sphere_loss(
        feats.astype(jnp.bfloat16), idxs, min_action_sphere_radius=min_r,
        max_action_sphere_radius=max_r, reduction="mean")
    out_bf16 = jax.block_until_ready(out_bf16)
    ref_bf16 = _reference_loss(feats.astype(jnp.bfloat16), idxs, min_r, max_r,
                               "mean")
    assert jnp.allclose(out_bf16, ref_bf16, rtol=2e-2, atol=2e-2), (out_bf16,
                                                                    ref_bf16)

    print("KERNEL_OK")
</pallas_src>

<mosaic_0001>
module attributes {stable_mosaic.version = 11 : i64} {
  func.func @_sphere_reduce_kernel(%arg0: i32, %arg1: i32, %arg2: memref<8x32xf32, #tpu.memory_space<vmem>>, %arg3: memref<8x1xf32, #tpu.memory_space<vmem>>, %arg4: memref<8x128xf32, #tpu.memory_space<vmem>>, %arg5: memref<8x1xf32, #tpu.memory_space<vmem>>) attributes {dimension_semantics = [#tpu.dimension_semantics<parallel>, #tpu.dimension_semantics<arbitrary>], iteration_bounds = array<i64: 2, 2>, scalar_prefetch = 0 : i64, scratch_operands = 1 : i64, tpu.core_type = #tpu.core_type<tc>, window_params = [{transform_indices = @transform_0, window_bounds = array<i64: 8, 32>}, {transform_indices = @transform_1, window_bounds = array<i64: 8, 1>}, {transform_indices = @transform_2, window_bounds = array<i64: 8, 128>}]} {
    %c0_i32 = arith.constant 0 : i32
    %0 = arith.cmpi eq, %arg1, %c0_i32 : i32
    %1 = arith.extui %0 : i1 to i32
    %c0_i32_0 = arith.constant 0 : i32
    %2 = arith.cmpi ne, %1, %c0_i32_0 : i32
    scf.if %2 {
      %cst_16 = arith.constant 0.000000e+00 : f32
      %40 = vector.broadcast %cst_16 : f32 to vector<8x1xf32>
      %c0_17 = arith.constant 0 : index
      %c0_18 = arith.constant 0 : index
      %41 = vector.load %arg5[%c0_17, %c0_18] : memref<8x1xf32, #tpu.memory_space<vmem>>, vector<8x1xf32>
      tpu.vector_store %arg5[%c0_17, %c0_18], %40 {strides = array<i32>} : memref<8x1xf32, #tpu.memory_space<vmem>>, vector<8x1xf32>,
    } else {
    }
    %c0 = arith.constant 0 : index
    %c0_1 = arith.constant 0 : index
    %3 = vector.load %arg2[%c0, %c0_1] : memref<8x32xf32, #tpu.memory_space<vmem>>, vector<8x32xf32>
    %c0_2 = arith.constant 0 : index
    %c0_3 = arith.constant 0 : index
    %4 = vector.load %arg3[%c0_2, %c0_3] : memref<8x1xf32, #tpu.memory_space<vmem>>, vector<8x1xf32>
    %5 = arith.mulf %3, %3 : vector<8x32xf32>
    %cst = arith.constant dense<0.000000e+00> : vector<8xf32>
    %6 = vector.multi_reduction <add>, %5, %cst [1] : vector<8x32xf32> to vector<8xf32>
    %7 = vector.shape_cast %6 : vector<8xf32> to vector<8x1xf32>
    %8 = math.sqrt %7 : vector<8x1xf32>
    %cst_4 = arith.constant 1.000000e+00 : f32
    %9 = vector.broadcast %cst_4 : f32 to vector<8x1xf32>
    %10 = arith.subf %9, %8 : vector<8x1xf32>
    %cst_5 = arith.constant 0.000000e+00 : f32
    %11 = vector.broadcast %cst_5 : f32 to vector<8x1xf32>
    %12 = arith.maximumf %10, %11 : vector<8x1xf32>
    %cst_6 = arith.constant 0.000000e+00 : f32
    %13 = vector.broadcast %cst_6 : f32 to vector<8x1xf32>
    %14 = arith.cmpf oge, %4, %13 : vector<8x1xf32>
    %15 = arith.select %14, %12, %8 : vector<8x1xi1>, vector<8x1xf32>
    %cst_7 = arith.constant 0.000000e+00 : f32
    %16 = vector.broadcast %cst_7 : f32 to vector<8x1xf32>
    %17 = arith.cmpf oeq, %15, %16 : vector<8x1xf32>
    %cst_8 = arith.constant 2.000000e+00 : f32
    %18 = vector.broadcast %cst_8 : f32 to vector<8x1xf32>
    %19 = arith.subf %8, %18 : vector<8x1xf32>
    %cst_9 = arith.constant 0.000000e+00 : f32
    %20 = vector.broadcast %cst_9 : f32 to vector<8x1xf32>
    %21 = arith.maximumf %19, %20 : vector<8x1xf32>
    %22 = arith.select %17, %21, %15 : vector<8x1xi1>, vector<8x1xf32>
    %23 = arith.mulf %22, %22 : vector<8x1xf32>
    %c2_i32 = arith.constant 2 : i32
    %24 = arith.muli %arg0, %c2_i32 : i32
    %25 = arith.addi %24, %arg1 : i32
    %c8_i32 = arith.constant 8 : i32
    %26 = arith.muli %25, %c8_i32 : i32
    %27 = tpu.iota {dimensions = array<i32: 0>} : vector<8x1xi32>
    %28 = vector.broadcast %26 : i32 to vector<8x1xi32>
    %29 = arith.addi %28, %27 : vector<8x1xi32>
    %c24_i32 = arith.constant 24 : i32
    %30 = vector.broadcast %c24_i32 : i32 to vector<8x1xi32>
    %31 = arith.cmpi slt, %29, %30 : vector<8x1xi32>
    %cst_10 = arith.constant 0.000000e+00 : f32
    %32 = vector.broadcast %cst_10 : f32 to vector<8x1xf32>
    %33 = arith.select %31, %23, %32 : vector<8x1xi1>, vector<8x1xf32>
    %c0_11 = arith.constant 0 : index
    %c0_12 = arith.constant 0 : index
    %34 = vector.load %arg5[%c0_11, %c0_12] : memref<8x1xf32, #tpu.memory_space<vmem>>, vector<8x1xf32>
    %35 = arith.addf %34, %33 : vector<8x1xf32>
    %c0_13 = arith.constant 0 : index
    %c0_14 = arith.constant 0 : index
    %36 = vector.load %arg5[%c0_13, %c0_14] : memref<8x1xf32, #tpu.memory_space<vmem>>, vector<8x1xf32>
    tpu.vector_store %arg5[%c0_13, %c0_14], %35 {strides = array<i32>} : memref<8x1xf32, #tpu.memory_space<vmem>>, vector<8x1xf32>,
    %c1_i32 = arith.constant 1 : i32
    %37 = arith.cmpi eq, %arg1, %c1_i32 : i32
    %38 = arith.extui %37 : i1 to i32
    %c0_i32_15 = arith.constant 0 : i32
    %39 = arith.cmpi ne, %38, %c0_i32_15 : i32
    scf.if %39 {
      %c0_16 = arith.constant 0 : index
      %c0_17 = arith.constant 0 : index
      %40 = vector.load %arg5[%c0_16, %c0_17] : memref<8x1xf32, #tpu.memory_space<vmem>>, vector<8x1xf32>
      %41 = vector.shape_cast %40 : vector<8x1xf32> to vector<1x8x1xf32>
      %cst_18 = arith.constant dense<0.000000e+00> : vector<1xf32>
      %42 = vector.multi_reduction <add>, %41, %cst_18 [1, 2] : vector<1x8x1xf32> to vector<1xf32>
      %43 = vector.shape_cast %42 : vector<1xf32> to vector<1x1x1xf32>
      %44 = vector.extract %43[0, 0, 0] : f32 from vector<1x1x1xf32>
      %45 = vector.broadcast %44 : f32 to vector<1x1xf32>
      %46 = vector.shape_cast %45 : vector<1x1xf32> to vector<1x1xf32>
      %47 = vector.broadcast %46 : vector<1x1xf32> to vector<8x128xf32>
      %c0_19 = arith.constant 0 : index
      %c0_20 = arith.constant 0 : index
      %48 = vector.load %arg4[%c0_19, %c0_20] : memref<8x128xf32, #tpu.memory_space<vmem>>, vector<8x128xf32>
      tpu.vector_store %arg4[%c0_19, %c0_20], %47 {strides = array<i32>} : memref<8x128xf32, #tpu.memory_space<vmem>>, vector<8x128xf32>,
    } else {
    }
    return
  }
  func.func @transform_0(%arg0: i32, %arg1: i32) -> (i32, i32) {
    %c2_i32 = arith.constant 2 : i32
    %0 = arith.muli %arg0, %c2_i32 : i32
    %1 = arith.addi %0, %arg1 : i32
    %c2_i32_0 = arith.constant 2 : i32
    %2 = arith.minsi %1, %c2_i32_0 : i32
    %c0_i32 = arith.constant 0 : i32
    %c0_i32_1 = arith.constant 0 : i32
    return %2, %c0_i32 : i32, i32
  }
  func.func @transform_1(%arg0: i32, %arg1: i32) -> (i32, i32) {
    %c2_i32 = arith.constant 2 : i32
    %0 = arith.muli %arg0, %c2_i32 : i32
    %1 = arith.addi %0, %arg1 : i32
    %c2_i32_0 = arith.constant 2 : i32
    %2 = arith.minsi %1, %c2_i32_0 : i32
    %c0_i32 = arith.constant 0 : i32
    %c0_i32_1 = arith.constant 0 : i32
    return %2, %c0_i32 : i32, i32
  }
  func.func @transform_2(%arg0: i32, %arg1: i32) -> (i32, i32) {
    %c0_i32 = arith.constant 0 : i32
    %c0_i32_0 = arith.constant 0 : i32
    return %arg0, %c0_i32 : i32, i32
  }
}

</mosaic_0001>

<bundles_post_ra>
// kernel: action_background_sphere_loss.1
= control target key start
LH: loop header
LB: loop body
LE: loop exit
PB: predicated region body
PF: predicated region fallthrough
CT: control target
= control target key end

     0   :  { %s487_s9 = smov 0   ;;  %s489_s10 = smov 0   ;;  %s554_s0 = inlined_call_operand.vmem [shape: f32[24,32], index: 0, kind: input, shape index: {}]   ;;  %s555_s1 = inlined_call_operand.vmem [shape: f32[24,1], index: 1, kind: input, shape index: {}]   ;;  %s556_s2 = inlined_call_operand.vmem [shape: f32[16,128], index: 2, kind: output, shape index: {}]  }
   0x1   :  { %s491_s11 = smov 0   ;;  %s493_s12 = smov 0  }
   0x2   :  { %s495_s13 = smov 0  }
   0x3 LB: > { %s21_s14 = sadd.s32 1, %s461_s11  ;;  %s24_s15 = sadd.s32 1, %s465_s12  ;;  %s469_s13 = sphi %s495_s13, %s12_s13   ;;  %s465_s12 = sphi %s493_s12, %s560_s12   ;;  %s461_s11 = sphi %s491_s11, %s559_s11   ;;  %s457_s10 = sphi %s489_s10, %s558_s10   ;;  %s453_s9 = sphi %s487_s9, %s557_s9  }
   0x4   : > { %p22_p0 = scmp.ge.s32.totalorder %s21_s14, 2  ;;  %p367_p1 = scmp.ge.s32.totalorder %s469_s13, 1 }
   0x5   : > { %p164_p2 = scmp.lt.s32.totalorder %s469_s13, 5 }
   0x6   : > { %s562_s14 = smov (%p22_p0, %s21_s14), 0  ;;  %s564_s15 = smov (!%p22_p0, %s24_s15), %s465_s12 }
   0x7   : > { %p165_p3 = pnand %p367_p1, %p164_p2  ;;  %p26_p4 = scmp.ge.s32.totalorder %s564_s15, 2 }
   0x8   : > { %s368_s16 = sshll.u32 (!%p165_p3), %s457_s10, 1  ;;  %p220_p5 = scmp.lt.s32.totalorder (!%p165_p3), %s457_s10, 1 }
   0x9   : > { %s566_s15 = smov (%p26_p4, %s564_s15), 0  ;;  %168 = sbr.rel (%p165_p3) target bundleno = 411 (0x19b), region = 28 }
   0xa   : > { %s520_s17 = sadd.s32 (!%p165_p3), %s453_s9, %s368_s16  ;;  %p379_p7 = scmp.ne.s32.totalorder (!%p165_p3), %s453_s9, 0 }
   0xb   : > { %p198_p6 = scmp.lt.s32.totalorder (!%p165_p3), %s520_s17, 2 }
  0x10   : > { %s568_s10 = smov (!%p220_p5, %s457_s10), 1  ;;  %227 = sbr.rel (%p379_p7) target bundleno = 23 (0x17), region = 32 }
  0x11   : > { %s199_s18 = scalar_select %p198_p6, %s520_s17, 2 }
  0x12   : > { %s378_s19 = sshll.u32 %s568_s10, 3  ;;  %vm228_vm0 = vcmask (!%p379_p7), 7168   ;;  %v471_v0 = vmov (!%p379_p7), 0.0  }
  0x13   : > { %s570_s18 = smov (!%p198_p6, %s199_s18), 2  ;;  %s527_s22 = scalar_lea.vmem %s556_s2, %s378_s19  ;;  %229 = vst.msk [vmem:[#allocation2] sm:$0xff] (!%p379_p7), %vm228_vm0, %v471_v0 }
  0x14   : > { %s372_s23 = sshll.u32 %s570_s18, 3 }
  0x15   : > { %s203_s26 = scalar_lea.vmem %s554_s0, %s372_s23  ;;  %s215_s29 = scalar_lea.vmem %s555_s1, %s372_s23 }
  0x17 PF: > { %v230_v1 = vld [vmem:[%s203_s26] sm:$0xff]  ;;  %vm233_vm1 = vcmask 261120   ;;  %v256_v5 = vlaneseq  ;;  %s382_s30 = sshll.u32 %s520_s17, 3  ;;  %vm264_vm7 = vcmask 7168   ;;  %p383_p8 = scmp.ne.s32.totalorder %s453_s9, 1 }
  0x18   : > { %v232_v2 = vmul.f32 %v230_v1, %v230_v1  ;;  %v231_v9 = vld [vmem:[%s215_s29] sm:$0xff]  ;;  %v258_v13 = vstv %s382_s30 }
  0x19   : > { %v257_v11 = vshrl.u32 %v256_v5, 7  ;;  %vm246_vm4 = vcmp.ge.f32.partialorder %v231_v9, 0.0 }
  0x1a   : > { %v234_v3 = vsel %vm233_vm1, %v232_v2, 0.0  ;;  %v262_v22 = vld [vmem:[#allocation2] sm:$0xff] }
  0x1b   : > { %235 = vadd.xlane.f32.xlu0 %v234_v3  ;;  %v259_v17 = vadd.s32 %v258_v13, %v257_v11 }
  0x1d   : > { %vm260_vm6 = vcmp.lt.s32.totalorder %v259_v17, 24 }
  0xa8   : > { %v236_v4 = vpop.xlane.xlu0 %235 }
  0xa9   : > { %429 = vrsqrt.f32 %v236_v4  ;;  %vm239_vm2 = vcmp.eq.f32.partialorder %v236_v4, inf  ;;  %v242_v8 = vand.u32 2147483648, %v236_v4  ;;  %vm241_vm3 = vcmp.eq.f32.partialorder %v236_v4, 0.0 }
  0xb3   : > { %v430_v6 = vpop.eup %429 }
  0xb4   : > { %v238_v7 = vmul.f32 %v430_v6, %v236_v4 }
  0xb6   : > { %v240_v10 = vsel %vm239_vm2, %v236_v4, %v238_v7 }
  0xb7   : > { %v243_v12 = vsel %vm241_vm3, %v242_v8, %v240_v10 }
  0xb8   : > { %v244_v14 = vsub.f32 1.0, %v243_v12  ;;  %v380_v15 = vadd.f32 -2.0, %v243_v12 }
  0xba   : > { %v245_v16 = vmax.f32 %v244_v14, 0.0  ;;  %v250_v19 = vmax.f32 %v380_v15, 0.0 }
  0xbc   : > { %v247_v18 = vsel %vm246_vm4, %v245_v16, %v243_v12 }
  0xbd   : > { %vm248_vm5 = vcmp.eq.f32.partialorder %v247_v18, 0.0 }
  0xbe   : > { %v251_v20 = vsel %vm248_vm5, %v250_v19, %v247_v18  ;;  %269 = sbr.rel (%p383_p8) target bundleno = 411 (0x19b), region = 36 }
  0xbf   : > { %v252_v21 = vmul.f32 %v251_v20, %v251_v20 }
  0xc1   : > { %v261_v23 = vsel %vm260_vm6, %v252_v21, 0.0 }
  0xc2   : > { %v263_v24 = vadd.f32 %v262_v22, %v261_v23 }
  0xc4   : > { %265 = vst.msk [vmem:[#allocation2] sm:$0xff] %vm264_vm7, %v263_v24 }
  0xcb   : > { %v270_v25 = vld [vmem:[#allocation2] sm:$0xff] }
  0xcc   : > { %v271_v26 = vsel %vm264_vm7, %v270_v25, 0.0 }
  0xcd   : > { %272 = vadd.xlane.f32.xlu0 %v271_v26 }
 0x15a   : > { %v273_v27 = vpop.xlane.xlu0 %272 }
 0x15b   : > { %v274_v28 = vrot.slane %v273_v27, 4 }
 0x15d   : > { %v275_v29 = vadd.f32 %v274_v28, %v273_v27 }
 0x15f   : > { %v276_v30 = vrot.slane %v275_v29, 2 }
 0x161   : > { %v277_v31 = vadd.f32 %v276_v30, %v275_v29 }
 0x163   : > { %v278_v32 = vrot.slane %v277_v31, 1 }
 0x165   : > { %v279_v33 = vadd.f32 %v278_v32, %v277_v31 }
 0x167   : > { %386 = vpush %v279_v33 }
 0x198   : > { %s387_s3 = spop %386 }
 0x199   : > { %v281_v34 = vstv %s387_s3 }
 0x19a   : > { %282 = vst [vmem:[%s527_s22] sm:$0xff] %v281_v34 }
 0x19b PF: > { %s12_s13 = sadd.s32 1, %s469_s13   ;;  %s557_s9 = smov %s461_s11 }
 0x19c   : > { %p9_p9 = scmp.ge.s32.totalorder %s12_s13, 6   ;;  %s558_s10 = smov %s465_s12 }
 0x19d   : > { %s559_s11 = smov %s562_s14  ;;  %s560_s12 = smov %s566_s15 }
 0x19e   :  { %11 = sbr.rel (!%p9_p9) target bundleno = 3 (0x3), region = 69 }

</bundles_post_ra>
